<compile_context>
chip_gen: v6e
topology: v6e:2x2x1
jax: 0.10.0
libtpu: 0.0.40
codegen_flags: <defaults>
</compile_context>

<pallas_src>
import functools

import jax
import jax.numpy as jnp
from jax.experimental import pallas as pl
from jax.experimental.pallas import tpu as pltpu


def _round_up(x, m):
    return ((x + m - 1) // m) * m


# ----------------------------------------------------------------------------
# Fused kernel: patch-embed tile -> sublane partial pool -> (last tile) fc
# ----------------------------------------------------------------------------
def _coatnet_fused_kernel(p_ref, w_ref, b_ref, fcw_ref, fcb_ref, out_ref,
                          acc_ref, *, inv_hw):
    # p_ref:   (1, TP, K)  compute dtype (bf16)   -- one HW tile of one batch
    # w_ref:   (K, C)      compute dtype (bf16)   -- embed weight (resident)
    # b_ref:   (1, C)      f32                    -- embed bias
    # fcw_ref: (C, Npad)   f32                    -- lane-padded fc weight
    # fcb_ref: (1, Npad)   f32                    -- lane-padded fc bias
    # out_ref: (1, 1, Npad) f32                   -- logits for this batch
    # acc_ref: (1, C)      f32 scratch            -- pooled-sum accumulator
    t = pl.program_id(1)

    @pl.when(t == 0)
    def _():
        acc_ref[...] = jnp.zeros_like(acc_ref)

    # Patch-embed this tile on the MXU: (TP, K) @ (K, C) -> (TP, C), f32 acc.
    feat = jnp.dot(p_ref[0], w_ref[...], preferred_element_type=jnp.float32)

    # Partial global-average-pool as a cross-sublane reduction (XLU/VPU);
    # no MXU re-push of the feature tile.  Zero-padded HW tail rows are
    # exactly 0 here because the embed bias is added only at finalize.
    acc_ref[...] += jnp.sum(feat, axis=0, keepdims=True)

    # Finalize on the last HW tile: mean + bias, then the CustomHead fc.
    @pl.when(t == pl.num_programs(1) - 1)
    def _():
        pooled = acc_ref[...] * inv_hw + b_ref[...]                  # (1, C)
        logits = jnp.dot(pooled, fcw_ref[...],
                         preferred_element_type=jnp.float32)         # (1, Npad)
        out_ref[0] = (logits + fcb_ref[...]).astype(out_ref.dtype)


# ----------------------------------------------------------------------------
# Full forward: CoatNetModel(inputs)  (NCHW input, as in PyTorch)
# ----------------------------------------------------------------------------
def coatnet_forward(x_nchw, params, *, compute_dtype=jnp.bfloat16,
                    max_rows_per_tile=512):
    B, Cin, H, W = x_nchw.shape
    ph = params["patch"]
    nH, nW = H // ph, W // ph
    HW = nH * nW
    K = Cin * ph * ph
    C = params["embed_w"].shape[1]
    N = params["fc_w"].shape[1]

    # Plain-JAX glue: NCHW -> (B, HW, K) channels-last patches (single fused
    # XLA reshape/transpose/cast pre-pass).
    p = x_nchw.reshape(B, Cin, nH, ph, nW, ph)
    p = jnp.transpose(p, (0, 2, 4, 1, 3, 5)).reshape(B, HW, K)

    # Row tile over HW: one tile per image when it fits (fills the MXU M
    # dimension and minimizes grid steps), else large multiple-of-8 tiles.
    HWpad8 = _round_up(HW, 8)
    if HW <= max_rows_per_tile:
        TP = HWpad8
    else:
        TP = _round_up(min(max_rows_per_tile, HWpad8), 8)
    n_t = pl.cdiv(HW, TP)
    HWpad = n_t * TP
    if HWpad != HW:
        p = jnp.pad(p, ((0, 0), (0, HWpad - HW), (0, 0)))
    p = p.astype(compute_dtype)

    # Lane-dense fc output: pad num_classes up to 128, slice outside.
    Npad = _round_up(max(N, 1), 128)
    fc_w = jnp.zeros((C, Npad), jnp.float32).at[:, :N].set(params["fc_w"])
    fc_b = jnp.zeros((1, Npad), jnp.float32).at[0, :N].set(params["fc_b"])

    embed_w = params["embed_w"].astype(compute_dtype)
    embed_b = params["embed_b"].reshape(1, C).astype(jnp.float32)

    # VMEM budget computed from the real working set; clamp well below the
    # 64 MiB physical ceiling on v7x (zero perf cost -- kernel is MXU-bound).
    cbytes = jnp.dtype(compute_dtype).itemsize
    vmem_need = (2 * TP * K * cbytes          # patch tile, double-buffered
                 + 2 * K * C * cbytes         # embed weight
                 + 2 * C * Npad * 4           # fc weight
                 + 2 * (C + Npad) * 4         # biases
                 + 2 * Npad * 4               # output block
                 + C * 4                      # pooled-sum scratch
                 + 2 * TP * C * 4)            # f32 feat intermediate headroom
    vmem_limit = int(min(32 * 1024 * 1024,
                         max(16 * 1024 * 1024, 2 * vmem_need)))

    kernel = functools.partial(_coatnet_fused_kernel, inv_hw=1.0 / HW)

    out = pl.pallas_call(
        kernel,
        out_shape=jax.ShapeDtypeStruct((B, 1, Npad), jnp.float32),
        grid_spec=pltpu.PrefetchScalarGridSpec(
            num_scalar_prefetch=0,
            grid=(B, n_t),
            in_specs=[
                pl.BlockSpec((1, TP, K), lambda b, t: (b, t, 0)),   # patches
                pl.BlockSpec((K, C), lambda b, t: (0, 0)),          # embed W
                pl.BlockSpec((1, C), lambda b, t: (0, 0)),          # embed b
                pl.BlockSpec((C, Npad), lambda b, t: (0, 0)),       # fc W
                pl.BlockSpec((1, Npad), lambda b, t: (0, 0)),       # fc b
            ],
            out_specs=pl.BlockSpec((1, 1, Npad), lambda b, t: (b, 0, 0)),
            scratch_shapes=[pltpu.VMEM((1, C), jnp.float32)],
        ),
        compiler_params=pltpu.CompilerParams(
            dimension_semantics=("parallel", "arbitrary"),
            vmem_limit_bytes=vmem_limit,
        ),
    )(p, embed_w, embed_b, fc_w, fc_b)

    return out.reshape(B, Npad)[:, :N]


def init_params(key, in_chans=3, patch=8, feat_dim=768, num_classes=1,
                init_gain=0.02):
    # Note: K = in_chans*patch**2; multiples of 256 (v6e/v7x) / 128 (v5e)
    # maximize MXU contraction efficiency for the synthetic stem.
    k1, k2, k3, k4 = jax.random.split(key, 4)
    kdim = in_chans * patch * patch
    return {
        "patch": patch,
        # synthetic backbone stem stand-in
        "embed_w": jax.random.normal(k1, (kdim, feat_dim), jnp.float32) * 0.02,
        "embed_b": jax.random.normal(k2, (feat_dim,), jnp.float32) * 0.02,
        # CustomHead fc: weight ~ N(0, init_gain) as in the module __init__.
        # PyTorch stores Linear weight as (out, in); kept transposed (in, out).
        "fc_w": jax.random.normal(k3, (feat_dim, num_classes), jnp.float32)
                * init_gain,
        "fc_b": (jax.random.uniform(k4, (num_classes,), jnp.float32,
                                    minval=-1.0, maxval=1.0)
                 / jnp.sqrt(jnp.float32(feat_dim))),
    }


if __name__ == "__main__":
    key = jax.random.PRNGKey(0)
    pkey, xkey = jax.random.split(key)

    params = init_params(pkey, in_chans=3, patch=8)

    # Small NCHW input: B=2, C=3, 40x40 -> 5x5 grid of 8x8 patches (HW=25,
    # K=192).  HW=25 is not a multiple of 8 so the zero-padded tail-row path
    # is exercised in both configurations below.
    x = jax.random.normal(xkey, (2, 3, 40, 40), jnp.float32)

    # Fast path: one HW tile per image (TP = padded HW).
    fwd = jax.jit(functools.partial(coatnet_forward, params=params))
    out = jax.block_until_ready(fwd(x))
    assert out.shape == (2, 1), out.shape

    # Multi-tile path: forces 2 HW tiles per image to exercise the pooling
    # accumulator (pl.when init / finalize) across grid steps.
    fwd_mt = jax.jit(functools.partial(coatnet_forward, params=params,
                                       max_rows_per_tile=16))
    out_mt = jax.block_until_ready(fwd_mt(x))
    assert out_mt.shape == (2, 1), out_mt.shape

    # Pure-JAX reference of the same forward (same bf16 MXU operands).
    B, Cin, H, W = x.shape
    ph = params["patch"]
    nH, nW = H // ph, W // ph
    HW, K = nH * nW, Cin * ph * ph
    p = x.reshape(B, Cin, nH, ph, nW, ph)
    p = jnp.transpose(p, (0, 2, 4, 1, 3, 5)).reshape(B, HW, K)
    feat = jnp.dot(p.astype(jnp.bfloat16).reshape(B * HW, K),
                   params["embed_w"].astype(jnp.bfloat16),
                   preferred_element_type=jnp.float32).reshape(B, HW, -1)
    feat = feat + params["embed_b"][None, None, :]
    pooled = feat.mean(axis=1)
    ref = jnp.dot(pooled, params["fc_w"],
                  preferred_element_type=jnp.float32,
                  precision=jax.lax.Precision.HIGHEST) + params["fc_b"]

    assert jnp.allclose(out, ref, atol=2e-3, rtol=2e-3), (out, ref)
    assert jnp.allclose(out_mt, ref, atol=2e-3, rtol=2e-3), (out_mt, ref)

    print("KERNEL_OK")
</pallas_src>

<mosaic_0001>
module attributes {stable_mosaic.version = 11 : i64} {
  func.func @_coatnet_fused_kernel(%arg0: i32, %arg1: i32, %arg2: memref<1x32x192xbf16, #tpu.memory_space<vmem>>, %arg3: memref<192x768xbf16, #tpu.memory_space<vmem>>, %arg4: memref<1x768xf32, #tpu.memory_space<vmem>>, %arg5: memref<768x128xf32, #tpu.memory_space<vmem>>, %arg6: memref<1x128xf32, #tpu.memory_space<vmem>>, %arg7: memref<1x1x128xf32, #tpu.memory_space<vmem>>, %arg8: memref<1x768xf32, #tpu.memory_space<vmem>>) attributes {dimension_semantics = [#tpu.dimension_semantics<parallel>, #tpu.dimension_semantics<arbitrary>], iteration_bounds = array<i64: 2, 1>, scalar_prefetch = 0 : i64, scratch_operands = 1 : i64, tpu.core_type = #tpu.core_type<tc>, window_params = [{transform_indices = @transform_0, window_bounds = array<i64: 1, 32, 192>}, {pipeline_mode = #tpu.pipeline_mode<synchronous>, transform_indices = @transform_1, window_bounds = array<i64: 192, 768>}, {pipeline_mode = #tpu.pipeline_mode<synchronous>, transform_indices = @transform_2, window_bounds = array<i64: 1, 768>}, {pipeline_mode = #tpu.pipeline_mode<synchronous>, transform_indices = @transform_3, window_bounds = array<i64: 768, 128>}, {pipeline_mode = #tpu.pipeline_mode<synchronous>, transform_indices = @transform_4, window_bounds = array<i64: 1, 128>}, {transform_indices = @transform_5, window_bounds = array<i64: 1, 1, 128>}]} {
    %c0_i32 = arith.constant 0 : i32
    %0 = arith.cmpi eq, %arg1, %c0_i32 : i32
    %1 = arith.extui %0 : i1 to i32
    %c0_i32_0 = arith.constant 0 : i32
    %2 = arith.cmpi ne, %1, %c0_i32_0 : i32
    scf.if %2 {
      %cst_12 = arith.constant 0.000000e+00 : f32
      %15 = vector.broadcast %cst_12 : f32 to vector<1x768xf32>
      %c0_13 = arith.constant 0 : index
      %c0_14 = arith.constant 0 : index
      %16 = vector.load %arg8[%c0_13, %c0_14] : memref<1x768xf32, #tpu.memory_space<vmem>>, vector<1x768xf32>
      tpu.vector_store %arg8[%c0_13, %c0_14], %15 {strides = array<i32>} : memref<1x768xf32, #tpu.memory_space<vmem>>, vector<1x768xf32>,
    } else {
    }
    %c0 = arith.constant 0 : index
    %c0_1 = arith.constant 0 : index
    %c0_2 = arith.constant 0 : index
    %3 = vector.load %arg2[%c0, %c0_1, %c0_2] : memref<1x32x192xbf16, #tpu.memory_space<vmem>>, vector<1x32x192xbf16>
    %4 = vector.shape_cast %3 : vector<1x32x192xbf16> to vector<32x192xbf16>
    %c0_3 = arith.constant 0 : index
    %c0_4 = arith.constant 0 : index
    %5 = vector.load %arg3[%c0_3, %c0_4] : memref<192x768xbf16, #tpu.memory_space<vmem>>, vector<192x768xbf16>
    %cst = arith.constant dense<0.000000e+00> : vector<32x768xf32>
    %6 = tpu.matmul %4, %5, %cst {dimension_numbers = #tpu.dot_dimension_numbers<[1], [0], [0], [1], [0, 0, 1, 1], [], []>} : vector<32x192xbf16>, vector<192x768xbf16>, vector<32x768xf32> -> vector<32x768xf32>
    %c0_5 = arith.constant 0 : index
    %c0_6 = arith.constant 0 : index
    %7 = vector.load %arg8[%c0_5, %c0_6] : memref<1x768xf32, #tpu.memory_space<vmem>>, vector<1x768xf32>
    %cst_7 = arith.constant dense<0.000000e+00> : vector<768xf32>
    %8 = vector.multi_reduction <add>, %6, %cst_7 [0] : vector<32x768xf32> to vector<768xf32>
    %9 = vector.shape_cast %8 : vector<768xf32> to vector<1x768xf32>
    %10 = arith.addf %7, %9 : vector<1x768xf32>
    %c0_8 = arith.constant 0 : index
    %c0_9 = arith.constant 0 : index
    %11 = vector.load %arg8[%c0_8, %c0_9] : memref<1x768xf32, #tpu.memory_space<vmem>>, vector<1x768xf32>
    tpu.vector_store %arg8[%c0_8, %c0_9], %10 {strides = array<i32>} : memref<1x768xf32, #tpu.memory_space<vmem>>, vector<1x768xf32>,
    %c0_i32_10 = arith.constant 0 : i32
    %12 = arith.cmpi eq, %arg1, %c0_i32_10 : i32
    %13 = arith.extui %12 : i1 to i32
    %c0_i32_11 = arith.constant 0 : i32
    %14 = arith.cmpi ne, %13, %c0_i32_11 : i32
    scf.if %14 {
      %c0_12 = arith.constant 0 : index
      %c0_13 = arith.constant 0 : index
      %15 = vector.load %arg8[%c0_12, %c0_13] : memref<1x768xf32, #tpu.memory_space<vmem>>, vector<1x768xf32>
      %cst_14 = arith.constant 4.000000e-02 : f32
      %16 = vector.broadcast %cst_14 : f32 to vector<1x768xf32>
      %17 = arith.mulf %15, %16 : vector<1x768xf32>
      %c0_15 = arith.constant 0 : index
      %c0_16 = arith.constant 0 : index
      %18 = vector.load %arg4[%c0_15, %c0_16] : memref<1x768xf32, #tpu.memory_space<vmem>>, vector<1x768xf32>
      %19 = arith.addf %17, %18 : vector<1x768xf32>
      %c0_17 = arith.constant 0 : index
      %c0_18 = arith.constant 0 : index
      %20 = vector.load %arg5[%c0_17, %c0_18] : memref<768x128xf32, #tpu.memory_space<vmem>>, vector<768x128xf32>
      %cst_19 = arith.constant dense<0.000000e+00> : vector<1x128xf32>
      %21 = tpu.matmul %19, %20, %cst_19 {dimension_numbers = #tpu.dot_dimension_numbers<[1], [0], [0], [1], [0, 0, 1, 1], [], []>} : vector<1x768xf32>, vector<768x128xf32>, vector<1x128xf32> -> vector<1x128xf32>
      %c0_20 = arith.constant 0 : index
      %c0_21 = arith.constant 0 : index
      %22 = vector.load %arg6[%c0_20, %c0_21] : memref<1x128xf32, #tpu.memory_space<vmem>>, vector<1x128xf32>
      %23 = arith.addf %21, %22 : vector<1x128xf32>
      %c0_22 = arith.constant 0 : index
      %c0_23 = arith.constant 0 : index
      %c0_24 = arith.constant 0 : index
      %24 = vector.load %arg7[%c0_22, %c0_23, %c0_24] : memref<1x1x128xf32, #tpu.memory_space<vmem>>, vector<1x1x128xf32>
      %25 = vector.shape_cast %24 : vector<1x1x128xf32> to vector<1x128xf32>
      %26 = vector.shape_cast %23 : vector<1x128xf32> to vector<1x1x128xf32>
      tpu.vector_store %arg7[%c0_22, %c0_23, %c0_24], %26 {strides = array<i32>} : memref<1x1x128xf32, #tpu.memory_space<vmem>>, vector<1x1x128xf32>,
    } else {
    }
    return
  }
  func.func @transform_0(%arg0: i32, %arg1: i32) -> (i32, i32, i32) {
    %c0_i32 = arith.constant 0 : i32
    %c0_i32_0 = arith.constant 0 : i32
    return %arg0, %arg1, %c0_i32 : i32, i32, i32
  }
  func.func @transform_1(%arg0: i32, %arg1: i32) -> (i32, i32) {
    %c0_i32 = arith.constant 0 : i32
    %c0_i32_0 = arith.constant 0 : i32
    %c0_i32_1 = arith.constant 0 : i32
    return %c0_i32, %c0_i32_0 : i32, i32
  }
  func.func @transform_2(%arg0: i32, %arg1: i32) -> (i32, i32) {
    %c0_i32 = arith.constant 0 : i32
    %c0_i32_0 = arith.constant 0 : i32
    %c0_i32_1 = arith.constant 0 : i32
    return %c0_i32, %c0_i32_0 : i32, i32
  }
  func.func @transform_3(%arg0: i32, %arg1: i32) -> (i32, i32) {
    %c0_i32 = arith.constant 0 : i32
    %c0_i32_0 = arith.constant 0 : i32
    %c0_i32_1 = arith.constant 0 : i32
    return %c0_i32, %c0_i32_0 : i32, i32
  }
  func.func @transform_4(%arg0: i32, %arg1: i32) -> (i32, i32) {
    %c0_i32 = arith.constant 0 : i32
    %c0_i32_0 = arith.constant 0 : i32
    %c0_i32_1 = arith.constant 0 : i32
    return %c0_i32, %c0_i32_0 : i32, i32
  }
  func.func @transform_5(%arg0: i32, %arg1: i32) -> (i32, i32, i32) {
    %c0_i32 = arith.constant 0 : i32
    %c0_i32_0 = arith.constant 0 : i32
    %c0_i32_1 = arith.constant 0 : i32
    return %arg0, %c0_i32, %c0_i32_0 : i32, i32, i32
  }
}

</mosaic_0001>

<bundles_post_ra>
// kernel: coatnet_forward.1
= control target key start
LH: loop header
LB: loop body
LE: loop exit
PB: predicated region body
PF: predicated region fallthrough
CT: control target
= control target key end

     0   :  { %s1793_s18 = smov 0   ;;  %s1795_s19 = smov 0   ;;  %s2383_s0 = inlined_call_operand.vmem [shape: bf16[2,32,192], index: 0, kind: input, shape index: {}]   ;;  %s2384_s1 = inlined_call_operand.vmem [shape: bf16[192,768], index: 1, kind: input, shape index: {}]   ;;  %s2385_s2 = inlined_call_operand.vmem [shape: f32[1,768], index: 2, kind: input, shape index: {}]   ;;  %s2386_s3 = inlined_call_operand.vmem [shape: f32[768,128], index: 3, kind: input, shape index: {}]   ;;  %s2387_s4 = inlined_call_operand.vmem [shape: f32[1,128], index: 4, kind: input, shape index: {}]   ;;  %s2388_s5 = inlined_call_operand.vmem [shape: f32[2,1,128], index: 5, kind: output, shape index: {}]  }
   0x1   :  { %s1797_s20 = smov 0  }
   0x2 LB: > { %s27_s21 = sadd.s32 1, %s1755_s19  ;;  %p1404_p0 = scmp.ge.s32.totalorder %s1759_s20, 1  ;;  %s1759_s20 = sphi %s1797_s20, %s15_s20   ;;  %s1755_s19 = sphi %s1795_s19, %s2392_s19   ;;  %s1751_s18 = sphi %s1793_s18, %s2391_s18  }
   0x3   : > { %p29_p1 = scmp.ge.s32.totalorder %s27_s21, 2  ;;  %p207_p2 = scmp.lt.s32.totalorder %s1759_s20, 3 }
   0x5   : > { %s2394_s21 = smov (%p29_p1, %s27_s21), 0  ;;  %p208_p3 = pnand %p1404_p0, %p207_p2 }
   0x6   : > { %p239_p4 = scmp.lt.s32.totalorder (!%p208_p3), %s1751_s18, 1 }
   0x7   : > { %211 = sbr.rel (%p208_p3) target bundleno = 589 (0x24d), region = 40 }
   0xc   : > { %v1623_v0 = vld [vmem:[%s2384_s1 + $0x154] ss:$24 sps:$4 sm:$0xff]   ;;  %v1627_v2 = vld [vmem:[%s2384_s1 + $0x150] ss:$24 sps:$4 sm:$0xff]   ;;  %v1629_v4 = vld [vmem:[%s2384_s1 + $0x124] ss:$24 sps:$4 sm:$0xff]  }
   0xd   : > { %v1625_v1 = vld [vmem:[%s2384_s1 + $0x15c] ss:$24 sps:$4 sm:$0xff]   ;;  %723 = vmatprep.subr.bf16.mxu0 %v1623_v0  ;;  %v1628_v3 = vld [vmem:[%s2384_s1 + $0x158] ss:$24 sps:$4 sm:$0xff]   ;;  %v1631_v5 = vld [vmem:[%s2384_s1 + $0x12c] ss:$24 sps:$4 sm:$0xff]  }
   0xe   : > { %776 = vmatprep.subr.bf16.mxu1 %v1625_v1  ;;  %724 = vmatpush1.bf16.msra.mxu0 %v1627_v2  ;;  %v1633_v6 = vld [vmem:[%s2384_s1 + $0x120] ss:$24 sps:$4 sm:$0xff]   ;;  %v1635_v8 = vld [vmem:[%s2384_s1 + $0xf4] ss:$24 sps:$4 sm:$0xff]   ;;  %v1639_v10 = vld [vmem:[%s2384_s1 + $0xf0] ss:$24 sps:$4 sm:$0xff]  }
   0xf   : > { %777 = vmatpush1.bf16.msra.mxu1 %v1628_v3  ;;  %725 = vmatprep.subr.bf16.mxu0 %v1629_v4  ;;  %v1634_v7 = vld [vmem:[%s2384_s1 + $0x128] ss:$24 sps:$4 sm:$0xff]   ;;  %v1637_v9 = vld [vmem:[%s2384_s1 + $0xfc] ss:$24 sps:$4 sm:$0xff]   ;;  %v1640_v11 = vld [vmem:[%s2384_s1 + $0xf8] ss:$24 sps:$4 sm:$0xff]  }
  0x10   : > { %778 = vmatprep.subr.bf16.mxu1 %v1631_v5  ;;  %v1641_v12 = vld [vmem:[%s2384_s1 + $0xc4] ss:$24 sps:$4 sm:$0xff]   ;;  %v1645_v14 = vld [vmem:[%s2384_s1 + $0xc0] ss:$24 sps:$4 sm:$0xff]   ;;  %v1647_v16 = vld [vmem:[%s2384_s1 + $0x94] ss:$24 sps:$4 sm:$0xff]  }
  0x11   : > { %v1643_v13 = vld [vmem:[%s2384_s1 + $0xcc] ss:$24 sps:$4 sm:$0xff]   ;;  %v1646_v15 = vld [vmem:[%s2384_s1 + $0xc8] ss:$24 sps:$4 sm:$0xff]   ;;  %v1649_v17 = vld [vmem:[%s2384_s1 + $0x9c] ss:$24 sps:$4 sm:$0xff]  }
  0x12   : > { %726 = vmatpush1.bf16.msra.mxu0 %v1633_v6  ;;  %v1651_v18 = vld [vmem:[%s2384_s1 + $0x90] ss:$24 sps:$4 sm:$0xff]   ;;  %v1653_v20 = vld [vmem:[%s2384_s1 + $0x64] ss:$24 sps:$4 sm:$0xff]   ;;  %v1657_v22 = vld [vmem:[%s2384_s1 + $0x60] ss:$24 sps:$4 sm:$0xff]  }
  0x13   : > { %779 = vmatpush1.bf16.msra.mxu1 %v1634_v7  ;;  %727 = vmatprep.subr.bf16.mxu0 %v1635_v8  ;;  %v1652_v19 = vld [vmem:[%s2384_s1 + $0x98] ss:$24 sps:$4 sm:$0xff]   ;;  %v1655_v21 = vld [vmem:[%s2384_s1 + $0x6c] ss:$24 sps:$4 sm:$0xff]   ;;  %v1658_v23 = vld [vmem:[%s2384_s1 + $0x68] ss:$24 sps:$4 sm:$0xff]  }
  0x14   : > { %780 = vmatprep.subr.bf16.mxu1 %v1637_v9  ;;  %v1659_v24 = vld [vmem:[%s2384_s1 + $0x34] ss:$24 sps:$4 sm:$0xff]   ;;  %s2396_s18 = smov (!%p239_p4, %s1751_s18), 1  ;;  %v1663_v26 = vld [vmem:[%s2384_s1 + $0x30] ss:$24 sps:$4 sm:$0xff]   ;;  %vm716_vm0 = vcmask 523264  }
  0x15   : > { %v1661_v25 = vld [vmem:[%s2384_s1 + $0x3c] ss:$24 sps:$4 sm:$0xff]   ;;  %v1664_v27 = vld [vmem:[%s2384_s1 + $0x38] ss:$24 sps:$4 sm:$0xff]   ;;  %v1667_v29 = vld [vmem:[%s2384_s1 + $0xc] ss:$24 sps:$4 sm:$0xff]   ;;  %s251_s9 = scalar_lea.vmem %s2388_s5, %s2396_s18 }
  0x16   : > { %728 = vmatpush1.bf16.msra.mxu0 %v1639_v10  ;;  %v1665_v28 = vld [vmem:[%s2384_s1 + $0x4] ss:$24 sps:$4 sm:$0xff]   ;;  %s1491_s15 = sshll.u32 %s2396_s18, 5  ;;  %v1669_v30 = vld [vmem:[%s2384_s1] ss:$24 sps:$4 sm:$0xff]  }
  0x17   : > { %781 = vmatpush1.bf16.msra.mxu1 %v1640_v11  ;;  %729 = vmatprep.subr.bf16.mxu0 %v1641_v12  ;;  %v1670_v31 = vld [vmem:[%s2384_s1 + $0x8] ss:$24 sps:$4 sm:$0xff]   ;;  %v1671_v32 = vld [vmem:[%s2384_s1 + $0x214] ss:$24 sps:$4 sm:$0xff]   ;;  %s1923_s30 = scalar_lea.vmem %s2383_s0, %s1491_s15  ;;  %v1676_v35 = vld [vmem:[%s2384_s1 + $0x218] ss:$24 sps:$4 sm:$0xff]  }
  0x18   : > { %782 = vmatprep.subr.bf16.mxu1 %v1643_v13  ;;  %v1673_v33 = vld [vmem:[%s2384_s1 + $0x21c] ss:$24 sps:$4 sm:$0xff]   ;;  %v1675_v34 = vld [vmem:[%s2384_s1 + $0x210] ss:$24 sps:$4 sm:$0xff]   ;;  %v1695_v37 = vld [vmem:[%s1923_s30 + $0x4] ss:$8 sps:$4 sm:$0xff]  }
  0x19   : > { %v1677_v36 = vld [vmem:[%s2384_s1 + $0x1e4] ss:$24 sps:$4 sm:$0xff]   ;;  %1483 = vmatprep.mubr.msk.bf16.mxu0 %vm716_vm0, %v1695_v37  ;;  %1485 = vmatprep.mubr.msk.bf16.mxu1 %vm716_vm0, %v1695_v37  ;;  %v1681_v39 = vld [vmem:[%s2384_s1 + $0x1e0] ss:$24 sps:$4 sm:$0xff]   ;;  %v1683_v41 = vld [vmem:[%s2384_s1 + $0x1b4] ss:$24 sps:$4 sm:$0xff]  }
  0x1a   : > { %730 = vmatpush1.bf16.msra.mxu0 %v1645_v14  ;;  %v1679_v38 = vld [vmem:[%s2384_s1 + $0x1ec] ss:$24 sps:$4 sm:$0xff]   ;;  %v1682_v40 = vld [vmem:[%s2384_s1 + $0x1e8] ss:$24 sps:$4 sm:$0xff]   ;;  %v1685_v42 = vld [vmem:[%s2384_s1 + $0x1bc] ss:$24 sps:$4 sm:$0xff]  }
  0x1b   : > { %783 = vmatpush1.bf16.msra.mxu1 %v1646_v15  ;;  %731 = vmatprep.subr.bf16.mxu0 %v1647_v16  ;;  %v1687_v43 = vld [vmem:[%s2384_s1 + $0x1b0] ss:$24 sps:$4 sm:$0xff]   ;;  %v1689_v45 = vld [vmem:[%s2384_s1 + $0x184] ss:$24 sps:$4 sm:$0xff]   ;;  %v1693_v47 = vld [vmem:[%s2384_s1 + $0x180] ss:$24 sps:$4 sm:$0xff]  }
  0x1c   : > { %784 = vmatprep.subr.bf16.mxu1 %v1649_v17  ;;  %v1688_v44 = vld [vmem:[%s2384_s1 + $0x1b8] ss:$24 sps:$4 sm:$0xff]   ;;  %v1691_v46 = vld [vmem:[%s2384_s1 + $0x18c] ss:$24 sps:$4 sm:$0xff]   ;;  %v1694_v48 = vld [vmem:[%s2384_s1 + $0x188] ss:$24 sps:$4 sm:$0xff]   ;;  %v257_v17 = vlaneseq }
  0x1d   : > { %v1700_v49 = vld [vmem:[%s2384_s1 + $0x164] ss:$24 sps:$4 sm:$0xff]   ;;  %v1697_v50 = vld [vmem:[%s1923_s30] ss:$8 sps:$4 sm:$0xff]   ;;  %v1703_v53 = vld [vmem:[%s2384_s1 + $0x134] ss:$24 sps:$4 sm:$0xff]  }
  0x1e   : > { %732 = vmatpush1.bf16.msra.mxu0 %v1651_v18  ;;  %v1698_v51 = vld [vmem:[%s2384_s1 + $0x160] ss:$24 sps:$4 sm:$0xff]   ;;  %v1704_v52 = vld [vmem:[%s1923_s30 + $0x14] ss:$8 sps:$4 sm:$0xff]   ;;  %v1701_v54 = vld [vmem:[%s2384_s1 + $0x130] ss:$24 sps:$4 sm:$0xff]  }
  0x1f   : > { %785 = vmatpush1.bf16.msra.mxu1 %v1652_v19  ;;  %733 = vmatprep.subr.bf16.mxu0 %v1653_v20  ;;  %v1709_v55 = vld [vmem:[%s2384_s1 + $0x104] ss:$24 sps:$4 sm:$0xff]   ;;  %v1706_v56 = vld [vmem:[%s1923_s30 + $0x10] ss:$8 sps:$4 sm:$0xff]   ;;  %v1712_v58 = vld [vmem:[%s2384_s1 + $0xd4] ss:$24 sps:$4 sm:$0xff]  }
  0x20   : > { %786 = vmatprep.subr.bf16.mxu1 %v1655_v21  ;;  %v1707_v57 = vld [vmem:[%s2384_s1 + $0x100] ss:$24 sps:$4 sm:$0xff]   ;;  %v1710_v59 = vld [vmem:[%s2384_s1 + $0xd0] ss:$24 sps:$4 sm:$0xff]   ;;  %v1715_v60 = vld [vmem:[%s2384_s1 + $0xa4] ss:$24 sps:$4 sm:$0xff]  }
  0x21   : > { %v1713_v61 = vld [vmem:[%s2384_s1 + $0xa0] ss:$24 sps:$4 sm:$0xff]   ;;  %v1718_v62 = vld [vmem:[%s2384_s1 + $0x74] ss:$24 sps:$4 sm:$0xff]   ;;  %v1716_v63 = vld [vmem:[%s2384_s1 + $0x70] ss:$24 sps:$4 sm:$0xff]  }
  0x22   : > { %734 = vmatpush1.bf16.msra.mxu0 %v1657_v22  ;;  %v1721_v0 = vld [vmem:[%s2384_s1 + $0x44] ss:$24 sps:$4 sm:$0xff]   ;;  %v1719_v1 = vld [vmem:[%s2384_s1 + $0x40] ss:$24 sps:$4 sm:$0xff]   ;;  %v1724_v2 = vld [vmem:[%s2384_s1 + $0x14] ss:$24 sps:$4 sm:$0xff]  }
  0x23   : > { %787 = vmatpush1.bf16.msra.mxu1 %v1658_v23  ;;  %735 = vmatprep.subr.bf16.mxu0 %v1659_v24  ;;  %v1722_v3 = vld [vmem:[%s2384_s1 + $0x10] ss:$24 sps:$4 sm:$0xff]   ;;  %v1727_v4 = vld [vmem:[%s2384_s1 + $0x224] ss:$24 sps:$4 sm:$0xff]   ;;  %v1725_v5 = vld [vmem:[%s2384_s1 + $0x220] ss:$24 sps:$4 sm:$0xff]  }
  0x24   : > { %788 = vmatprep.subr.bf16.mxu1 %v1661_v25  ;;  %v1730_v6 = vld [vmem:[%s2384_s1 + $0x1f4] ss:$24 sps:$4 sm:$0xff]   ;;  %v1728_v7 = vld [vmem:[%s2384_s1 + $0x1f0] ss:$24 sps:$4 sm:$0xff]   ;;  %v1733_v8 = vld [vmem:[%s2384_s1 + $0x1c4] ss:$24 sps:$4 sm:$0xff]  }
  0x25   : > { %v1731_v9 = vld [vmem:[%s2384_s1 + $0x1c0] ss:$24 sps:$4 sm:$0xff]   ;;  %v1736_v10 = vld [vmem:[%s2384_s1 + $0x194] ss:$24 sps:$4 sm:$0xff]   ;;  %v1734_v11 = vld [vmem:[%s2384_s1 + $0x190] ss:$24 sps:$4 sm:$0xff]  }
  0x26   : > { %736 = vmatpush1.bf16.msra.mxu0 %v1663_v26  ;;  %v1028_v12 = vld [vmem:[%s2386_s3 + $0xf8] sm:$0xff]  ;;  %v1027_v15 = vld [vmem:[%s2386_s3 + $0xf0] sm:$0xff]  ;;  %v1026_v20 = vld [vmem:[%s2386_s3 + $0xe8] sm:$0xff]  ;;  %vm2077_vm1 = vcmp.lt.s32.totalorder %v257_v17, 768  ;;  %v1761_v25 = vmov 0.0  }
  0x27   : > { %789 = vmatpush1.bf16.msra.mxu1 %v1664_v27  ;;  %737 = vmatprep.subr.bf16.mxu0 %v1665_v28  ;;  %v1012_v13 = vld [vmem:[%s2386_s3 + $0x78] sm:$0xff]  ;;  %v1011_v18 = vld [vmem:[%s2386_s3 + $0x70] sm:$0xff]  ;;  %v1010_v23 = vld [vmem:[%s2386_s3 + $0x68] sm:$0xff]  ;;  %261 = vst.msk [vmem:[#allocation2] sm:$0x3f] %vm2077_vm1, %v1761_v25 }
  0x28   : > { %790 = vmatprep.subr.bf16.mxu1 %v1667_v29  ;;  %v1092_v14 = vld [vmem:[%s2386_s3 + $0x2f8] sm:$0xff]  ;;  %v1091_v19 = vld [vmem:[%s2386_s3 + $0x2f0] sm:$0xff]  ;;  %v1090_v24 = vld [vmem:[%s2386_s3 + $0x2e8] sm:$0xff] }
  0x29   : > { %v1076_v16 = vld [vmem:[%s2386_s3 + $0x278] sm:$0xff]  ;;  %v1075_v21 = vld [vmem:[%s2386_s3 + $0x270] sm:$0xff]  ;;  %v1025_v26 = vld [vmem:[%s2386_s3 + $0xe0] sm:$0xff] }
  0x2a   : > { %738 = vmatpush1.bf16.msra.mxu0 %v1669_v30  ;;  %v1074_v27 = vld [vmem:[%s2386_s3 + $0x268] sm:$0xff]  ;;  %v1009_v28 = vld [vmem:[%s2386_s3 + $0x60] sm:$0xff]  ;;  %v1024_v30 = vld [vmem:[%s2386_s3 + $0xd8] sm:$0xff] }
  0x2b   : > { %791 = vmatpush1.bf16.msra.mxu1 %v1670_v31  ;;  %747 = vmatprep.subr.bf16.mxu0 %v1671_v32  ;;  %v1089_v29 = vld [vmem:[%s2386_s3 + $0x2e0] sm:$0xff]  ;;  %v1008_v32 = vld [vmem:[%s2386_s3 + $0x58] sm:$0xff] }
  0x2c   : > { %800 = vmatprep.subr.bf16.mxu1 %v1673_v33  ;;  %v1073_v31 = vld [vmem:[%s2386_s3 + $0x260] sm:$0xff]  ;;  %v1088_v33 = vld [vmem:[%s2386_s3 + $0x2d8] sm:$0xff] }
  0x2e   : > { %748 = vmatpush2.bf16.msra.mxu0 %v1675_v34  ;;  %v1023_v34 = vld [vmem:[%s2386_s3 + $0xd0] sm:$0xff] }
  0x2f   : > { %801 = vmatpush2.bf16.msra.mxu1 %v1676_v35  ;;  %749 = vmatprep.subr.bf16.mxu0 %v1677_v36  ;;  %v1072_v35 = vld [vmem:[%s2386_s3 + $0x258] sm:$0xff]  ;;  %v1007_v36 = vld [vmem:[%s2386_s3 + $0x50] sm:$0xff] }
  0x30   : > { %802 = vmatprep.subr.bf16.mxu1 %v1679_v38  ;;  %v1022_v38 = vld [vmem:[%s2386_s3 + $0xc8] sm:$0xff] }
  0x32   : > { %750 = vmatpush2.bf16.msra.mxu0 %v1681_v39  ;;  %v1071_v39 = vld [vmem:[%s2386_s3 + $0x250] sm:$0xff] }
  0x33   : > { %803 = vmatpush2.bf16.msra.mxu1 %v1682_v40  ;;  %751 = vmatprep.subr.bf16.mxu0 %v1683_v41  ;;  %v1006_v40 = vld [vmem:[%s2386_s3 + $0x48] sm:$0xff] }
  0x34   : > { %804 = vmatprep.subr.bf16.mxu1 %v1685_v42  ;;  %v1086_v41 = vld [vmem:[%s2386_s3 + $0x2c8] sm:$0xff]  ;;  %v1021_v42 = vld [vmem:[%s2386_s3 + $0xc0] sm:$0xff] }
  0x36   : > { %752 = vmatpush2.bf16.msra.mxu0 %v1687_v43  ;;  %v1070_v43 = vld [vmem:[%s2386_s3 + $0x248] sm:$0xff] }
  0x37   : > { %805 = vmatpush2.bf16.msra.mxu1 %v1688_v44  ;;  %753 = vmatprep.subr.bf16.mxu0 %v1689_v45  ;;  %v1005_v44 = vld [vmem:[%s2386_s3 + $0x40] sm:$0xff] }
  0x38   : > { %806 = vmatprep.subr.bf16.mxu1 %v1691_v46  ;;  %v1085_v45 = vld [vmem:[%s2386_s3 + $0x2c0] sm:$0xff]  ;;  %v1020_v46 = vld [vmem:[%s2386_s3 + $0xb8] sm:$0xff] }
  0x3a   : > { %754 = vmatpush2.bf16.msra.mxu0 %v1693_v47  ;;  %v1069_v47 = vld [vmem:[%s2386_s3 + $0x240] sm:$0xff] }
  0x3b   : > { %807 = vmatpush2.bf16.msra.mxu1 %v1694_v48  ;;  %829 = vmatprep.subr.bf16.mxu0 %v1700_v49  ;;  %v1004_v48 = vld [vmem:[%s2386_s3 + $0x38] sm:$0xff] }
  0x3c   : > { %1492 = vmatprep.subr.mxu1 %v1028_v12  ;;  %v1084_v49 = vld [vmem:[%s2386_s3 + $0x2b8] sm:$0xff]  ;;  %v997_v12 = vld [vmem:[%s2386_s3] sm:$0xff] }
  0x3d   : > { %756 = vmatmul.mubr.bf16.vlgmr.msra.gmra.mxu0 %v1697_v50 }
  0x3e   : > { %809 = vmatmul.mubr.bf16.vlgmr.msra.gmra.mxu1 %v1697_v50  ;;  %830 = vmatpush1.bf16.msra.mxu0 %v1698_v51  ;;  %v1068_v51 = vld [vmem:[%s2386_s3 + $0x238] sm:$0xff] }
  0x3f   : > { %1484 = vmatprep.mubr.msk.bf16.mxu0 %vm716_vm0, %v1704_v52  ;;  %831 = vmatprep.subr.bf16.mxu0 %v1703_v53  ;;  %v1083_v53 = vld [vmem:[%s2386_s3 + $0x2b0] sm:$0xff] }
  0x40   : > { %1486 = vmatprep.mubr.msk.bf16.mxu1 %vm716_vm0, %v1704_v52  ;;  %1493 = vmatpush3.msra.mxu1 %v1012_v13  ;;  %v1077_v13 = vld [vmem:[%s2386_s3 + $0x280] sm:$0xff] }
  0x41   : > { %1494 = vmatprep.subr.mxu1 %v1027_v15  ;;  %v1061_v15 = vld [vmem:[%s2386_s3 + $0x200] sm:$0xff] }
  0x42   : > { %832 = vmatpush1.bf16.msra.mxu0 %v1701_v54  ;;  %1495 = vmatpush3.msra.mxu1 %v1011_v18  ;;  %v1018_v54 = vld [vmem:[%s2386_s3 + $0xa8] sm:$0xff] }
  0x43   : > { %833 = vmatprep.subr.bf16.mxu0 %v1709_v55  ;;  %1496 = vmatprep.subr.mxu1 %v1026_v20  ;;  %v1067_v55 = vld [vmem:[%s2386_s3 + $0x230] sm:$0xff] }
  0x44   : > { %1497 = vmatpush3.msra.mxu1 %v1010_v23 }
  0x45   : > { %766 = vmatmul.mubr.bf16.gmra.mxu0 %v1706_v56  ;;  %1498 = vmatprep.subr.mxu1 %v1025_v26 }
  0x46   : > { %819 = vmatmul.mubr.bf16.gmra.mxu1 %v1706_v56  ;;  %834 = vmatpush1.bf16.msra.mxu0 %v1707_v57  ;;  %v1082_v57 = vld [vmem:[%s2386_s3 + $0x2a8] sm:$0xff] }
  0x47   : > { %1487 = vmatprep.mubr.msk.bf16.mxu0 %vm716_vm0, %v1695_v37  ;;  %835 = vmatprep.subr.bf16.mxu0 %v1712_v58  ;;  %v1087_v37 = vld [vmem:[%s2386_s3 + $0x2d0] sm:$0xff]  ;;  %v1017_v58 = vld [vmem:[%s2386_s3 + $0xa0] sm:$0xff] }
  0x48   : > { %1499 = vmatpush3.msra.mxu1 %v1009_v28 }
  0x49   : > { %1500 = vmatprep.subr.mxu1 %v1024_v30 }
  0x4a   : > { %836 = vmatpush1.bf16.msra.mxu0 %v1710_v59  ;;  %1501 = vmatpush3.msra.mxu1 %v1008_v32  ;;  %v1066_v59 = vld [vmem:[%s2386_s3 + $0x228] sm:$0xff] }
  0x4b   : > { %837 = vmatprep.subr.bf16.mxu0 %v1715_v60  ;;  %1502 = vmatprep.subr.mxu1 %v1023_v34  ;;  %v1001_v60 = vld [vmem:[%s2386_s3 + $0x20] sm:$0xff] }
  0x4c   : > { %1503 = vmatpush3.msra.mxu1 %v1007_v36 }
  0x4d   : > { %1504 = vmatprep.subr.mxu1 %v1022_v38 }
  0x4e   : > { %838 = vmatpush1.bf16.msra.mxu0 %v1713_v61  ;;  %1505 = vmatpush3.msra.mxu1 %v1006_v40  ;;  %v1081_v61 = vld [vmem:[%s2386_s3 + $0x2a0] sm:$0xff] }
  0x4f   : > { %839 = vmatprep.subr.bf16.mxu0 %v1718_v62  ;;  %1506 = vmatprep.subr.mxu1 %v1021_v42  ;;  %v1016_v62 = vld [vmem:[%s2386_s3 + $0x98] sm:$0xff] }
  0x50   : > { %1507 = vmatpush3.msra.mxu1 %v1005_v44 }
  0x51   : > { %1508 = vmatprep.subr.mxu1 %v1020_v46 }
  0x52   : > { %840 = vmatpush1.bf16.msra.mxu0 %v1716_v63  ;;  %1509 = vmatpush3.msra.mxu1 %v1004_v48  ;;  %v1065_v63 = vld [vmem:[%s2386_s3 + $0x220] sm:$0xff] }
  0x53   : > { %841 = vmatprep.subr.bf16.mxu0 %v1721_v0  ;;  %v1000_v0 = vld [vmem:[%s2386_s3 + $0x18] sm:$0xff] }
  0x56   : > { %842 = vmatpush1.bf16.msra.mxu0 %v1719_v1  ;;  %v1080_v1 = vld [vmem:[%s2386_s3 + $0x298] sm:$0xff] }
  0x57   : > { %843 = vmatprep.subr.bf16.mxu0 %v1724_v2  ;;  %v1015_v2 = vld [vmem:[%s2386_s3 + $0x90] sm:$0xff] }
  0x5a   : > { %844 = vmatpush1.bf16.msra.mxu0 %v1722_v3  ;;  %v1064_v3 = vld [vmem:[%s2386_s3 + $0x218] sm:$0xff] }
  0x5b   : > { %853 = vmatprep.subr.bf16.mxu0 %v1727_v4  ;;  %v999_v4 = vld [vmem:[%s2386_s3 + $0x10] sm:$0xff] }
  0x5e   : > { %854 = vmatpush2.bf16.msra.mxu0 %v1725_v5  ;;  %v1079_v5 = vld [vmem:[%s2386_s3 + $0x290] sm:$0xff] }
  0x5f   : > { %855 = vmatprep.subr.bf16.mxu0 %v1730_v6  ;;  %v1014_v6 = vld [vmem:[%s2386_s3 + $0x88] sm:$0xff] }
  0x62   : > { %856 = vmatpush2.bf16.msra.mxu0 %v1728_v7  ;;  %v1063_v7 = vld [vmem:[%s2386_s3 + $0x210] sm:$0xff] }
  0x63   : > { %857 = vmatprep.subr.bf16.mxu0 %v1733_v8  ;;  %v998_v8 = vld [vmem:[%s2386_s3 + $0x8] sm:$0xff] }
  0x66   : > { %858 = vmatpush2.bf16.msra.mxu0 %v1731_v9  ;;  %v1078_v9 = vld [vmem:[%s2386_s3 + $0x288] sm:$0xff] }
  0x67   : > { %859 = vmatprep.subr.bf16.mxu0 %v1736_v10  ;;  %v1013_v10 = vld [vmem:[%s2386_s3 + $0x80] sm:$0xff] }
  0x6a   : > { %860 = vmatpush2.bf16.msra.mxu0 %v1734_v11  ;;  %v1062_v11 = vld [vmem:[%s2386_s3 + $0x208] sm:$0xff] }
  0x6b   : > { %1562 = vmatprep.subr.mxu0 %v1092_v14  ;;  %v1060_v14 = vld [vmem:[%s2386_s3 + $0x1f8] sm:$0xff] }
  0x6d   : > { %862 = vmatmul.mubr.bf16.vlgmr.msra.gmra.mxu0 %v1697_v50  ;;  %v1019_v50 = vld [vmem:[%s2386_s3 + $0xb0] sm:$0xff] }
  0x6e   : > { %1488 = vmatprep.mubr.msk.bf16.mxu0 %vm716_vm0, %v1704_v52  ;;  %1563 = vmatpush3.msra.mxu0 %v1076_v16  ;;  %v1003_v52 = vld [vmem:[%s2386_s3 + $0x30] sm:$0xff] }
  0x6f   : > { %1564 = vmatprep.subr.mxu0 %v1091_v19  ;;  %1510 = vmatprep.subr.mxu1 %v1019_v50 }
  0x70   : > { %1565 = vmatpush3.msra.mxu0 %v1075_v21  ;;  %1511 = vmatpush3.msra.mxu1 %v1003_v52 }
  0x71   : > { %1566 = vmatprep.subr.mxu0 %v1090_v24  ;;  %1512 = vmatprep.subr.mxu1 %v1018_v54 }
  0x72   : > { %1567 = vmatpush3.msra.mxu0 %v1074_v27 }
  0x73   : > { %1568 = vmatprep.subr.mxu0 %v1089_v29 }
  0x74   : > { %1569 = vmatpush3.msra.mxu0 %v1073_v31 }
  0x75   : > { %872 = vmatmul.mubr.bf16.gmra.mxu0 %v1706_v56  ;;  %1570 = vmatprep.subr.mxu0 %v1088_v33  ;;  %v1002_v56 = vld [vmem:[%s2386_s3 + $0x28] sm:$0xff] }
  0x76   : > { %1571 = vmatpush3.msra.mxu0 %v1072_v35  ;;  %1513 = vmatpush3.msra.mxu1 %v1002_v56 }
  0x77   : > { %1572 = vmatprep.subr.mxu0 %v1087_v37  ;;  %1514 = vmatprep.subr.mxu1 %v1017_v58 }
  0x78   : > { %1573 = vmatpush3.msra.mxu0 %v1071_v39  ;;  %1515 = vmatpush3.msra.mxu1 %v1001_v60 }
  0x79   : > { %1574 = vmatprep.subr.mxu0 %v1086_v41  ;;  %1516 = vmatprep.subr.mxu1 %v1016_v62 }
  0x7a   : > { %1575 = vmatpush3.msra.mxu0 %v1070_v43  ;;  %1517 = vmatpush3.msra.mxu1 %v1000_v0 }
  0x7b   : > { %1576 = vmatprep.subr.mxu0 %v1085_v45  ;;  %1518 = vmatprep.subr.mxu1 %v1015_v2 }
  0x7c   : > { %1577 = vmatpush3.msra.mxu0 %v1069_v47  ;;  %1519 = vmatpush3.msra.mxu1 %v999_v4 }
  0x7d   : > { %1578 = vmatprep.subr.mxu0 %v1084_v49  ;;  %1520 = vmatprep.subr.mxu1 %v1014_v6 }
  0x7e   : > { %1579 = vmatpush3.msra.mxu0 %v1068_v51  ;;  %1521 = vmatpush3.msra.mxu1 %v998_v8  ;;  %v1762_v8 = vmov 1966171168  }
  0x7f   : > { %1580 = vmatprep.subr.mxu0 %v1083_v53  ;;  %1522 = vmatprep.subr.mxu1 %v1013_v10 }
  0x80   : > { %1581 = vmatpush3.msra.mxu0 %v1067_v55  ;;  %1523 = vmatpush3.msra.mxu1 %v997_v12 }
  0x81   : > { %1582 = vmatprep.subr.mxu0 %v1082_v57  ;;  %1527 = vmatprep.subr.mxu1 %v1060_v14 }
  0x82   : > { %1583 = vmatpush3.msra.mxu0 %v1066_v59 }
  0x83   : > { %1584 = vmatprep.subr.mxu0 %v1081_v61 }
  0x84   : > { %1585 = vmatpush3.msra.mxu0 %v1065_v63 }
  0x85   : > { %1586 = vmatprep.subr.mxu0 %v1080_v1 }
  0x86   : > { %1587 = vmatpush3.msra.mxu0 %v1064_v3 }
  0x87   : > { %1588 = vmatprep.subr.mxu0 %v1079_v5 }
  0x88   : > { %1589 = vmatpush3.msra.mxu0 %v1063_v7 }
  0x89   : > { %1590 = vmatprep.subr.mxu0 %v1078_v9  ;;  %v947_v9 = vunpack.c.l.s4 %v1762_v8  ;;  %v1055_v8 = vld [vmem:[%s2386_s3 + $0x1d0] sm:$0xff] }
  0x8a   : > { %1591 = vmatpush3.msra.mxu0 %v1062_v11 }
  0x8b   : > { %1592 = vmatprep.subr.mxu0 %v1077_v13 }
  0x8c   : > { %1593 = vmatpush3.msra.mxu0 %v1061_v15 }
  0xfd   : > { %v757_v16 = vpop.f32.mrf.mxu0 }
  0xfe   : > { %v810_v18 = vpop.f32.mrf.mxu1 }
  0xff   : > { %v759_v19 = vpop.f32.mrf.mxu0 }
 0x100   : > { %v812_v20 = vpop.f32.mrf.mxu1 }
 0x101   : > { %v761_v21 = vpop.f32.mrf.mxu0 }
 0x102   : > { %v814_v23 = vpop.f32.mrf.mxu1  ;;  %v883_v39 = vadd.f32 %v761_v21, %v757_v16  ;;  %v948_v21 = vunpack.c.0.s8 %v947_v9  ;;  %v1039_v9 = vld [vmem:[%s2386_s3 + $0x150] sm:$0xff] }
 0x103   : > { %v763_v24 = vpop.f32.mrf.mxu0  ;;  %v901_v30 = vadd.f32 %v814_v23, %v810_v18  ;;  %v2252_v23 = vshrl.u32 %v257_v17, 7 }
 0x104   : > { %v816_v25 = vpop.f32.mrf.mxu1  ;;  %v892_v35 = vadd.f32 %v763_v24, %v759_v19 }
 0x105   : > { %v767_v26 = vpop.f32.mrf.mxu0  ;;  %v910_v31 = vadd.f32 %v816_v25, %v812_v20 }
 0x106   : > { %v820_v27 = vpop.f32.mrf.mxu1  ;;  %v884_v42 = vadd.f32 %v883_v39, %v767_v26 }
 0x107   : > { %v769_v28 = vpop.f32.mrf.mxu0  ;;  %v902_v34 = vadd.f32 %v901_v30, %v820_v27 }
 0x108   : > { %v822_v29 = vpop.f32.mrf.mxu1  ;;  %v893_v40 = vadd.f32 %v892_v35, %v769_v28 }
 0x109   : > { %v771_v32 = vpop.f32.mrf.mxu0  ;;  %v911_v36 = vadd.f32 %v910_v31, %v822_v29  ;;  %v951_v31 = vsub.s32 %v948_v21, %v2252_v23  ;;  %v1049_v21 = vld [vmem:[%s2386_s3 + $0x1a0] sm:$0xff] }
 0x10a   : > { %v824_v33 = vpop.f32.mrf.mxu1  ;;  %v885_v45 = vadd.f32 %v884_v42, %v771_v32 }
 0x10b   : > { %v773_v37 = vpop.f32.mrf.mxu0  ;;  %v903_v41 = vadd.f32 %v902_v34, %v824_v33 }
 0x10c   : > { %v826_v38 = vpop.f32.mrf.mxu1  ;;  %v894_v43 = vadd.f32 %v893_v40, %v773_v37  ;;  %v886_v49 = vrot.slane %v885_v45, 4 }
 0x10d   : > { %v912_v44 = vadd.f32 %v911_v36, %v826_v38  ;;  %v904_v46 = vrot.slane %v903_v41, 4 }
 0x10e   : > { %v895_v47 = vrot.slane %v894_v43, 4  ;;  %v887_v55 = vadd.f32 %v886_v49, %v885_v45 }
 0x10f   : > { %v913_v48 = vrot.slane %v912_v44, 4  ;;  %v905_v50 = vadd.f32 %v904_v46, %v903_v41 }
 0x110   : > { %v896_v52 = vadd.f32 %v895_v47, %v894_v43  ;;  %v888_v61 = vrot.slane %v887_v55, 2  ;;  %v882_v47 = vld [vmem:[#allocation2] sm:$0x3f] }
 0x111   : > { %v914_v53 = vadd.f32 %v913_v48, %v912_v44  ;;  %v906_v56 = vrot.slane %v905_v50, 2 }
 0x112   : > { %v897_v58 = vrot.slane %v896_v52, 2  ;;  %v889_v4 = vadd.f32 %v888_v61, %v887_v55  ;;  %v1097_v55 = vsub.s32 0, %v2252_v23 }
 0x113   : > { %v915_v59 = vrot.slane %v914_v53, 2  ;;  %v907_v62 = vadd.f32 %v906_v56, %v905_v50  ;;  %v1113_v56 = vsub.s32 4, %v2252_v23 }
 0x114   : > { %v898_v0 = vadd.f32 %v897_v58, %v896_v52  ;;  %v890_v16 = vrot.slane %v889_v4, 1  ;;  %v1101_v52 = vsub.s32 1, %v2252_v23  ;;  %v1109_v58 = vsub.s32 3, %v2252_v23 }
 0x115   : > { %v916_v1 = vadd.f32 %v915_v59, %v914_v53  ;;  %v908_v7 = vrot.slane %v907_v62, 1 }
 0x116   : > { %v899_v11 = vrot.slane %v898_v0, 1  ;;  %v891_v28 = vadd.f32 %v890_v16, %v889_v4  ;;  %v1057_v4 = vld [vmem:[%s2386_s3 + $0x1e0] sm:$0xff]  ;;  %v1051_v16 = vld [vmem:[%s2386_s3 + $0x1b0] sm:$0xff] }
 0x117   : > { %v917_v12 = vrot.slane %v916_v1, 1  ;;  %v909_v20 = vadd.f32 %v908_v7, %v907_v62  ;;  %v1044_v62 = vld [vmem:[%s2386_s3 + $0x178] sm:$0xff] }
 0x118   : > { %v900_v24 = vadd.f32 %v899_v11, %v898_v0  ;;  %v1040_v7 = vld [vmem:[%s2386_s3 + $0x158] sm:$0xff]  ;;  %v1038_v11 = vld [vmem:[%s2386_s3 + $0x148] sm:$0xff] }
 0x119   : > { %v918_v25 = vadd.f32 %v917_v12, %v916_v1  ;;  %v1043_v1 = vld [vmem:[%s2386_s3 + $0x170] sm:$0xff]  ;;  %v1053_v12 = vld [vmem:[%s2386_s3 + $0x1c0] sm:$0xff] }
 0x11a   : > { %v943_v32 = vcombine.low %v891_v28, %v900_v24  ;;  %v1033_v24 = vld [vmem:[%s2386_s3 + $0x120] sm:$0xff]  ;;  %v1031_v28 = vld [vmem:[%s2386_s3 + $0x110] sm:$0xff] }
 0x11b   : > { %v944_v33 = vcombine.low %v909_v20, %v918_v25  ;;  %v1034_v20 = vld [vmem:[%s2386_s3 + $0x128] sm:$0xff]  ;;  %v1048_v25 = vld [vmem:[%s2386_s3 + $0x198] sm:$0xff] }
 0x11c   : > { %v952_v38 = vrot.slane %v943_v32, %v951_v31  ;;  %v1045_v32 = vld [vmem:[%s2386_s3 + $0x180] sm:$0xff] }
 0x11d   : > { %v959_v39 = vrot.slane %v944_v33, %v951_v31  ;;  %v1029_v33 = vld [vmem:[%s2386_s3 + $0x100] sm:$0xff] }
 0x11f   : > { %v967_v42 = vcombine.low %v952_v38, %v959_v39  ;;  %v1093_v38 = vld [vmem:[%s2387_s4] sm:$0x1] }
 0x121   : > { %v974_v45 = vrot.slane %v967_v42, %v951_v31 }
 0x12d   : > { %v863_v51 = vpop.f32.mrf.mxu0 }
 0x12f   : > { %v865_v54 = vpop.f32.mrf.mxu0 }
 0x131   : > { %v867_v57 = vpop.f32.mrf.mxu0 }
 0x132   : > { %v919_v2 = vadd.f32 %v867_v57, %v863_v51  ;;  %v995_v51 = vld [vmem:[%s2385_s2] sm:$0x3f] }
 0x133   : > { %v869_v60 = vpop.f32.mrf.mxu0 }
 0x134   : > { %v928_v5 = vadd.f32 %v869_v60, %v865_v54  ;;  %v1117_v54 = vsub.s32 5, %v2252_v23 }
 0x135   : > { %v873_v63 = vpop.f32.mrf.mxu0 }
 0x136   : > { %v920_v6 = vadd.f32 %v919_v2, %v873_v63  ;;  %v1059_v63 = vld [vmem:[%s2386_s3 + $0x1f0] sm:$0xff]  ;;  %v1058_v2 = vld [vmem:[%s2386_s3 + $0x1e8] sm:$0xff] }
 0x137   : > { %v875_v3 = vpop.f32.mrf.mxu0 }
 0x138   : > { %v929_v13 = vadd.f32 %v928_v5, %v875_v3  ;;  %v1042_v3 = vld [vmem:[%s2386_s3 + $0x168] sm:$0xff]  ;;  %v1041_v5 = vld [vmem:[%s2386_s3 + $0x160] sm:$0xff] }
 0x139   : > { %v877_v10 = vpop.f32.mrf.mxu0 }
 0x13a   : > { %v921_v14 = vadd.f32 %v920_v6, %v877_v10  ;;  %v1056_v6 = vld [vmem:[%s2386_s3 + $0x1d8] sm:$0xff]  ;;  %v1054_v10 = vld [vmem:[%s2386_s3 + $0x1c8] sm:$0xff] }
 0x13b   : > { %v879_v15 = vpop.f32.mrf.mxu0 }
 0x13c   : > { %v922_v18 = vrot.slane %v921_v14, 4  ;;  %v930_v19 = vadd.f32 %v929_v13, %v879_v15  ;;  %v1037_v13 = vld [vmem:[%s2386_s3 + $0x140] sm:$0xff]  ;;  %v1036_v15 = vld [vmem:[%s2386_s3 + $0x138] sm:$0xff] }
 0x13e   : > { %v923_v26 = vadd.f32 %v922_v18, %v921_v14  ;;  %v931_v27 = vrot.slane %v930_v19, 4  ;;  %v1052_v14 = vld [vmem:[%s2386_s3 + $0x1b8] sm:$0xff]  ;;  %v1035_v18 = vld [vmem:[%s2386_s3 + $0x130] sm:$0xff] }
 0x140   : > { %v924_v29 = vrot.slane %v923_v26, 2  ;;  %v932_v30 = vadd.f32 %v931_v27, %v930_v19  ;;  %v1050_v19 = vld [vmem:[%s2386_s3 + $0x1a8] sm:$0xff]  ;;  %v1047_v27 = vld [vmem:[%s2386_s3 + $0x190] sm:$0xff] }
 0x142   : > { %v925_v34 = vadd.f32 %v924_v29, %v923_v26  ;;  %v933_v35 = vrot.slane %v932_v30, 2  ;;  %v1032_v26 = vld [vmem:[%s2386_s3 + $0x118] sm:$0xff]  ;;  %v1046_v29 = vld [vmem:[%s2386_s3 + $0x188] sm:$0xff] }
 0x144   : > { %v926_v36 = vrot.slane %v925_v34, 1  ;;  %v934_v37 = vadd.f32 %v933_v35, %v932_v30  ;;  %v1030_v30 = vld [vmem:[%s2386_s3 + $0x108] sm:$0xff] }
 0x146   : > { %v935_v40 = vrot.slane %v934_v37, 1  ;;  %v927_v17 = vadd.f32 %v926_v36, %v925_v34 }
 0x148   : > { %v936_v41 = vadd.f32 %v935_v40, %v934_v37 }
 0x14a   : > { %v945_v43 = vcombine.low %v927_v17, %v936_v41 }
 0x14c   : > { %v966_v44 = vrot.slane %v945_v43, %v951_v31 }
 0x14e   : > { %v981_v46 = vrot.slane %v966_v44, %v951_v31  ;;  %v1105_v31 = vsub.s32 2, %v2252_v23 }
 0x150   : > { %v982_v48 = vcombine.low %v974_v45, %v981_v46 }
 0x152   : > { %v984_v49 = vadd.f32 %v982_v48, %v882_v47 }
 0x154   : > { %989 = vst.msk [vmem:[#allocation2] sm:$0x3f] %vm2077_vm1, %v984_v49 }
 0x15b   : > { %v993_v50 = vld [vmem:[#allocation2] sm:$0x3f] }
 0x15c   : > { %v994_v53 = vmul.f32 0.04, %v993_v50 }
 0x15e   : > { %v2264_v57 = vadd.f32 %v995_v51, %v994_v53 }
 0x160   : > { %v1102_v22 = vrot.slane %v2264_v57, %v1101_v52  ;;  %v1118_v59 = vrot.slane %v2264_v57, %v1117_v54  ;;  %v1098_v60 = vrot.slane %v2264_v57, %v1097_v55  ;;  %v1114_v61 = vrot.slane %v2264_v57, %v1113_v56 }
 0x161   : > { %v1110_v0 = vrot.slane %v2264_v57, %v1109_v58  ;;  %v1106_v34 = vrot.slane %v2264_v57, %v1105_v31 }
 0x162   : > { %1189 = vmatprep.mubr.f32.mxu1 %v1102_v22  ;;  %1329 = vmatprep.mubr.f32.mxu0 %v1118_v59 }
 0x163   : > { %1190 = vmatmul.mubr.f32.vlgmr.msra.gmra.mxu1 %v1098_v60  ;;  %1330 = vmatmul.mubr.f32.vlgmr.msra.gmra.mxu0 %v1114_v61 }
 0x164   : > { %1528 = vmatpush3.msra.mxu1 %v1044_v62  ;;  %1259 = vmatprep.mubr.f32.mxu1 %v1110_v0 }
 0x165   : > { %1529 = vmatprep.subr.mxu1 %v1059_v63 }
 0x166   : > { %1530 = vmatpush3.msra.mxu1 %v1043_v1 }
 0x167   : > { %1531 = vmatprep.subr.mxu1 %v1058_v2 }
 0x168   : > { %1532 = vmatpush3.msra.mxu1 %v1042_v3 }
 0x169   : > { %1533 = vmatprep.subr.mxu1 %v1057_v4 }
 0x16a   : > { %1534 = vmatpush3.msra.mxu1 %v1041_v5 }
 0x16b   : > { %1535 = vmatprep.subr.mxu1 %v1056_v6 }
 0x16c   : > { %1536 = vmatpush3.msra.mxu1 %v1040_v7 }
 0x16d   : > { %1537 = vmatprep.subr.mxu1 %v1055_v8 }
 0x16e   : > { %1538 = vmatpush3.msra.mxu1 %v1039_v9 }
 0x16f   : > { %1539 = vmatprep.subr.mxu1 %v1054_v10 }
 0x170   : > { %1540 = vmatpush3.msra.mxu1 %v1038_v11 }
 0x171   : > { %1541 = vmatprep.subr.mxu1 %v1053_v12 }
 0x172   : > { %1542 = vmatpush3.msra.mxu1 %v1037_v13 }
 0x173   : > { %1543 = vmatprep.subr.mxu1 %v1052_v14 }
 0x174   : > { %1544 = vmatpush3.msra.mxu1 %v1036_v15 }
 0x175   : > { %1545 = vmatprep.subr.mxu1 %v1051_v16 }
 0x176   : > { %1546 = vmatpush3.msra.mxu1 %v1035_v18 }
 0x177   : > { %1547 = vmatprep.subr.mxu1 %v1050_v19 }
 0x178   : > { %1548 = vmatpush3.msra.mxu1 %v1034_v20 }
 0x179   : > { %1549 = vmatprep.subr.mxu1 %v1049_v21 }
 0x17a   : > { %1550 = vmatpush3.msra.mxu1 %v1033_v24 }
 0x17b   : > { %1551 = vmatprep.subr.mxu1 %v1048_v25 }
 0x17c   : > { %1552 = vmatpush3.msra.mxu1 %v1032_v26 }
 0x17d   : > { %1553 = vmatprep.subr.mxu1 %v1047_v27 }
 0x17e   : > { %1554 = vmatpush3.msra.mxu1 %v1031_v28 }
 0x17f   : > { %1555 = vmatprep.subr.mxu1 %v1046_v29 }
 0x180   : > { %1556 = vmatpush3.msra.mxu1 %v1030_v30 }
 0x181   : > { %1557 = vmatprep.subr.mxu1 %v1045_v32 }
 0x182   : > { %1558 = vmatpush3.msra.mxu1 %v1029_v33 }
 0x183   : > { %1260 = vmatmul.mubr.f32.vlgmr.msra.gmra.mxu1 %v1106_v34 }
 0x223   : > { %v1524_v35 = vpop.f32.mrf.mxu1  ;;  %v1594_v23 = vpop.f32.mrf.mxu0 }
 0x225   : > { %v1525_v36 = vpop.f32.mrf.mxu1  ;;  %v1595_v40 = vpop.f32.mrf.mxu0 }
 0x226   : > { %v1526_v37 = vadd.f32 %v1525_v36, %v1524_v35  ;;  %v1596_v43 = vadd.f32 %v1595_v40, %v1594_v23 }
 0x228   : > { %v1192_v41 = vadd.f32 %v1526_v37, %v1093_v38 }
 0x243   : > { %v1559_v39 = vpop.f32.mrf.mxu1 }
 0x245   : > { %v1560_v17 = vpop.f32.mrf.mxu1 }
 0x246   : > { %v1561_v42 = vadd.f32 %v1560_v17, %v1559_v39 }
 0x248   : > { %v1262_v44 = vadd.f32 %v1561_v42, %v1192_v41 }
 0x24a   : > { %v1332_v45 = vadd.f32 %v1596_v43, %v1262_v44 }
 0x24c   : > { %1335 = vst [vmem:[%s251_s9] sm:$0x1] %v1332_v45 }
 0x24d PF: > { %s15_s20 = sadd.s32 1, %s1759_s20   ;;  %s2391_s18 = smov %s1755_s19 }
 0x24e   : > { %p12_p5 = scmp.ge.s32.totalorder %s15_s20, 4   ;;  %s2392_s19 = smov %s2394_s21 }
 0x250   :  { %14 = sbr.rel (!%p12_p5) target bundleno = 2 (0x2), region = 78 }

</bundles_post_ra>
